<compile_context>
chip_gen: v5e
topology: v5e:2x2
jax: 0.10.0
libtpu: 0.0.40
codegen_flags: <defaults>
</compile_context>

<pallas_src>
from functools import partial

import jax
import jax.numpy as jnp
from jax.experimental import pallas as pl
from jax.experimental.pallas import tpu as pltpu


def _rnn_fc_kernel(x_ref,        # (B*T, D)  batch-major rows (b*T + t)
                   wih0_ref,     # (D, H)
                   whh0_ref,     # (H, H)
                   b0_ref,       # (1, H)    = b_ih0 + b_hh0
                   w1_ref,       # (2H, H)   = [Wih1^T ; Whh1^T]
                   b1_ref,       # (1, H)    = b_ih1 + b_hh1
                   wfc_ref,      # (H, C)
                   bfc_ref,      # (1, C)
                   out_ref,      # (B*T, C)  batch-major rows (b*T + t)
                   hidden_ref,   # (2*B, H)  [h0_final ; h1_final]
                   *, B, T):
    H = whh0_ref.shape[0]

    # Hoisted loads of the weights used inside the serial loop.
    whh0 = whh0_ref[...]
    w1 = w1_ref[...]
    b1 = b1_ref[...]

    # ---- Layer-0 input projection (+ bias): ONE batched MXU matmul over all B*T rows.
    p0 = (jnp.dot(x_ref[...], wih0_ref[...], preferred_element_type=jnp.float32)
          + b0_ref[...])                                        # (B*T, H)

    # Static per-step row gather (batch-major rows {b*T+t}) -> (B, H) blocks.
    # Depends only on p0, so it is OFF the recurrent dependency chain.
    p0_t = [
        jnp.concatenate([p0[b * T + t: b * T + t + 1, :] for b in range(B)], axis=0)
        for t in range(T)
    ]

    # ---- Skew-interleaved two-layer recurrence (fully unrolled, ~T+1 serial links).
    zeros = jnp.zeros((B, H), jnp.float32)
    h0_prev = zeros          # h0[s-1]
    h1_prev = zeros          # h1[s-2]
    h1_steps = []
    for s in range(T + 1):
        # Layer 0, step s: depends only on h0[s-1].
        h0_next = (jnp.tanh(p0_t[s] + jnp.dot(h0_prev, whh0,
                                              preferred_element_type=jnp.float32))
                   if s < T else h0_prev)
        # Layer 1, step s-1: fused input+recurrent matmul, depends on h0[s-1], h1[s-2].
        if s >= 1:
            cat = jnp.concatenate([h0_prev, h1_prev], axis=1)   # (B, 2H)
            h1_prev = jnp.tanh(jnp.dot(cat, w1,
                                       preferred_element_type=jnp.float32) + b1)
            h1_steps.append(h1_prev)
        h0_prev = h0_next

    # Final hidden states, one bulk 2-D store.
    hidden_ref[...] = jnp.concatenate([h0_prev, h1_prev], axis=0)   # (2*B, H)

    # ---- FC head: build the operand directly in batch-major row order (b*T + t),
    # one MXU matmul, one bulk lane-dense 2-D store.
    fc_in = jnp.concatenate(
        [h1_steps[t][b: b + 1, :] for b in range(B) for t in range(T)], axis=0)  # (B*T, H)
    out_ref[...] = (jnp.dot(fc_in, wfc_ref[...], preferred_element_type=jnp.float32)
                    + bfc_ref[...])


def prepare_params(params):
    """One-time weight preprocessing (PyTorch stores W for x @ W^T):
    transpose weights, pre-sum the two per-layer biases, stack [Wih1^T; Whh1^T]."""
    wih0, whh0, bih0, bhh0, wih1, whh1, bih1, bhh1, wfc, bfc = params
    H = whh0.shape[0]
    C = wfc.shape[0]
    return (
        wih0.T.astype(jnp.float32),                              # (D, H)
        whh0.T.astype(jnp.float32),                              # (H, H)
        (bih0 + bhh0).reshape(1, H).astype(jnp.float32),         # (1, H)
        jnp.concatenate([wih1.T, whh1.T], axis=0).astype(jnp.float32),  # (2H, H)
        (bih1 + bhh1).reshape(1, H).astype(jnp.float32),         # (1, H)
        wfc.T.astype(jnp.float32),                               # (H, C)
        bfc.reshape(1, C).astype(jnp.float32),                   # (1, C)
    )


@jax.jit
def rnn_model_forward(x, prepped):
    """x: (B, T, D) float32, prepped = prepare_params(params).
    Returns (out: (B,T,C), hidden: (2,B,H)) like RNNModel.forward."""
    B, T, D = x.shape
    wih0_t, whh0_t, b0, w1, b1, wfc_t, bfc = prepped
    H = whh0_t.shape[0]
    C = wfc_t.shape[1]

    # Free collapse (no transpose): rows of x2d are batch-major (b*T + t).
    x2d = x.astype(jnp.float32).reshape(B * T, D)

    vmem = pl.BlockSpec(memory_space=pltpu.MemorySpace.VMEM)
    out2d, hid2d = pl.pallas_call(
        partial(_rnn_fc_kernel, B=B, T=T),
        out_shape=(
            jax.ShapeDtypeStruct((B * T, C), jnp.float32),
            jax.ShapeDtypeStruct((2 * B, H), jnp.float32),
        ),
        in_specs=[vmem] * 8,
        out_specs=(vmem, vmem),
    )(x2d, wih0_t, whh0_t, b0, w1, b1, wfc_t, bfc)

    # Free collapses back to module output shapes (no transposes).
    out = out2d.reshape(B, T, C)
    hidden = hid2d.reshape(2, B, H)
    return out, hidden


def make_params(key, D, H, C):
    """Deterministic params; PyTorch default nn.RNN/Linear init: U(-1/sqrt(H), 1/sqrt(H))."""
    ks = jax.random.split(key, 10)
    bound = 1.0 / jnp.sqrt(H)
    u = lambda k, shape: jax.random.uniform(k, shape, jnp.float32, -bound, bound)
    wih0 = u(ks[0], (H, D))
    whh0 = u(ks[1], (H, H))
    bih0 = u(ks[2], (H,))
    bhh0 = u(ks[3], (H,))
    wih1 = u(ks[4], (H, H))
    whh1 = u(ks[5], (H, H))
    bih1 = u(ks[6], (H,))
    bhh1 = u(ks[7], (H,))
    wfc = u(ks[8], (C, H))
    bfc = u(ks[9], (C,))
    return (wih0, whh0, bih0, bhh0, wih1, whh1, bih1, bhh1, wfc, bfc)


def ref_forward(x, params):
    """Pure-JAX reference of the PyTorch forward (for correctness check)."""
    wih0, whh0, bih0, bhh0, wih1, whh1, bih1, bhh1, wfc, bfc = params
    B = x.shape[0]
    H = whh0.shape[0]

    def run_layer(inp, wih, whh, bih, bhh):
        def step(h, x_t):
            h = jnp.tanh(x_t @ wih.T + bih + h @ whh.T + bhh)
            return h, h
        hT, outs = jax.lax.scan(step, jnp.zeros((B, H), jnp.float32),
                                jnp.swapaxes(inp, 0, 1))
        return jnp.swapaxes(outs, 0, 1), hT

    o0, h0 = run_layer(x, wih0, whh0, bih0, bhh0)
    o1, h1 = run_layer(o0, wih1, whh1, bih1, bhh1)
    out = o1 @ wfc.T + bfc
    hidden = jnp.stack([h0, h1], axis=0)
    return out, hidden


if __name__ == "__main__":
    # Small shapes consistent with the module: batch=2, seq=8, embedding_dim=16,
    # hidden size=32, num_layers=2, number_of_output_classes=2.
    B, T, D, H, C = 2, 8, 16, 32, 2

    key = jax.random.PRNGKey(0)
    kx, kp = jax.random.split(key)
    x = jax.random.normal(kx, (B, T, D), jnp.float32)
    params = make_params(kp, D, H, C)
    prepped = prepare_params(params)

    out, hidden = rnn_model_forward(x, prepped)
    out = jax.block_until_ready(out)
    hidden = jax.block_until_ready(hidden)

    ref_out, ref_hidden = ref_forward(x, params)
    assert out.shape == (B, T, C) and hidden.shape == (2, B, H)
    assert jnp.allclose(out, ref_out, atol=1e-4, rtol=1e-4)
    assert jnp.allclose(hidden, ref_hidden, atol=1e-4, rtol=1e-4)

    print("KERNEL_OK")
</pallas_src>

<mosaic_0001>
module attributes {stable_mosaic.version = 11 : i64} {
  func.func @_rnn_fc_kernel(%arg0: memref<16x16xf32, #tpu.memory_space<vmem>>, %arg1: memref<16x32xf32, #tpu.memory_space<vmem>>, %arg2: memref<32x32xf32, #tpu.memory_space<vmem>>, %arg3: memref<1x32xf32, #tpu.memory_space<vmem>>, %arg4: memref<64x32xf32, #tpu.memory_space<vmem>>, %arg5: memref<1x32xf32, #tpu.memory_space<vmem>>, %arg6: memref<32x2xf32, #tpu.memory_space<vmem>>, %arg7: memref<1x2xf32, #tpu.memory_space<vmem>>, %arg8: memref<16x2xf32, #tpu.memory_space<vmem>>, %arg9: memref<4x32xf32, #tpu.memory_space<vmem>>) attributes {dimension_semantics = [], scalar_prefetch = 0 : i64, scratch_operands = 0 : i64, tpu.core_type = #tpu.core_type<tc>} {
    %c0 = arith.constant 0 : index
    %c0_0 = arith.constant 0 : index
    %0 = vector.load %arg2[%c0, %c0_0] : memref<32x32xf32, #tpu.memory_space<vmem>>, vector<32x32xf32>
    %c0_1 = arith.constant 0 : index
    %c0_2 = arith.constant 0 : index
    %1 = vector.load %arg4[%c0_1, %c0_2] : memref<64x32xf32, #tpu.memory_space<vmem>>, vector<64x32xf32>
    %c0_3 = arith.constant 0 : index
    %c0_4 = arith.constant 0 : index
    %2 = vector.load %arg5[%c0_3, %c0_4] : memref<1x32xf32, #tpu.memory_space<vmem>>, vector<1x32xf32>
    %c0_5 = arith.constant 0 : index
    %c0_6 = arith.constant 0 : index
    %3 = vector.load %arg0[%c0_5, %c0_6] : memref<16x16xf32, #tpu.memory_space<vmem>>, vector<16x16xf32>
    %c0_7 = arith.constant 0 : index
    %c0_8 = arith.constant 0 : index
    %4 = vector.load %arg1[%c0_7, %c0_8] : memref<16x32xf32, #tpu.memory_space<vmem>>, vector<16x32xf32>
    %cst = arith.constant dense<0.000000e+00> : vector<16x32xf32>
    %5 = tpu.matmul %3, %4, %cst {dimension_numbers = #tpu.dot_dimension_numbers<[1], [0], [0], [1], [0, 0, 1, 1], [], []>} : vector<16x16xf32>, vector<16x32xf32>, vector<16x32xf32> -> vector<16x32xf32>
    %c0_9 = arith.constant 0 : index
    %c0_10 = arith.constant 0 : index
    %6 = vector.load %arg3[%c0_9, %c0_10] : memref<1x32xf32, #tpu.memory_space<vmem>>, vector<1x32xf32>
    %7 = vector.broadcast %6 : vector<1x32xf32> to vector<16x32xf32>
    %8 = arith.addf %5, %7 : vector<16x32xf32>
    %9 = vector.extract_strided_slice %8 {offsets = [0, 0], sizes = [1, 32], strides = [1, 1]} : vector<16x32xf32> to vector<1x32xf32>
    %10 = vector.extract_strided_slice %8 {offsets = [8, 0], sizes = [1, 32], strides = [1, 1]} : vector<16x32xf32> to vector<1x32xf32>
    %11 = tpu.concatenate %9, %10 in 0 : vector<1x32xf32>, vector<1x32xf32> -> vector<2x32xf32>
    %12 = vector.extract_strided_slice %8 {offsets = [1, 0], sizes = [1, 32], strides = [1, 1]} : vector<16x32xf32> to vector<1x32xf32>
    %13 = vector.extract_strided_slice %8 {offsets = [9, 0], sizes = [1, 32], strides = [1, 1]} : vector<16x32xf32> to vector<1x32xf32>
    %14 = tpu.concatenate %12, %13 in 0 : vector<1x32xf32>, vector<1x32xf32> -> vector<2x32xf32>
    %15 = vector.extract_strided_slice %8 {offsets = [2, 0], sizes = [1, 32], strides = [1, 1]} : vector<16x32xf32> to vector<1x32xf32>
    %16 = vector.extract_strided_slice %8 {offsets = [10, 0], sizes = [1, 32], strides = [1, 1]} : vector<16x32xf32> to vector<1x32xf32>
    %17 = tpu.concatenate %15, %16 in 0 : vector<1x32xf32>, vector<1x32xf32> -> vector<2x32xf32>
    %18 = vector.extract_strided_slice %8 {offsets = [3, 0], sizes = [1, 32], strides = [1, 1]} : vector<16x32xf32> to vector<1x32xf32>
    %19 = vector.extract_strided_slice %8 {offsets = [11, 0], sizes = [1, 32], strides = [1, 1]} : vector<16x32xf32> to vector<1x32xf32>
    %20 = tpu.concatenate %18, %19 in 0 : vector<1x32xf32>, vector<1x32xf32> -> vector<2x32xf32>
    %21 = vector.extract_strided_slice %8 {offsets = [4, 0], sizes = [1, 32], strides = [1, 1]} : vector<16x32xf32> to vector<1x32xf32>
    %22 = vector.extract_strided_slice %8 {offsets = [12, 0], sizes = [1, 32], strides = [1, 1]} : vector<16x32xf32> to vector<1x32xf32>
    %23 = tpu.concatenate %21, %22 in 0 : vector<1x32xf32>, vector<1x32xf32> -> vector<2x32xf32>
    %24 = vector.extract_strided_slice %8 {offsets = [5, 0], sizes = [1, 32], strides = [1, 1]} : vector<16x32xf32> to vector<1x32xf32>
    %25 = vector.extract_strided_slice %8 {offsets = [13, 0], sizes = [1, 32], strides = [1, 1]} : vector<16x32xf32> to vector<1x32xf32>
    %26 = tpu.concatenate %24, %25 in 0 : vector<1x32xf32>, vector<1x32xf32> -> vector<2x32xf32>
    %27 = vector.extract_strided_slice %8 {offsets = [6, 0], sizes = [1, 32], strides = [1, 1]} : vector<16x32xf32> to vector<1x32xf32>
    %28 = vector.extract_strided_slice %8 {offsets = [14, 0], sizes = [1, 32], strides = [1, 1]} : vector<16x32xf32> to vector<1x32xf32>
    %29 = tpu.concatenate %27, %28 in 0 : vector<1x32xf32>, vector<1x32xf32> -> vector<2x32xf32>
    %30 = vector.extract_strided_slice %8 {offsets = [7, 0], sizes = [1, 32], strides = [1, 1]} : vector<16x32xf32> to vector<1x32xf32>
    %31 = vector.extract_strided_slice %8 {offsets = [15, 0], sizes = [1, 32], strides = [1, 1]} : vector<16x32xf32> to vector<1x32xf32>
    %32 = tpu.concatenate %30, %31 in 0 : vector<1x32xf32>, vector<1x32xf32> -> vector<2x32xf32>
    %cst_11 = arith.constant 0.000000e+00 : f32
    %33 = vector.broadcast %cst_11 : f32 to vector<2x32xf32>
    %cst_12 = arith.constant dense<0.000000e+00> : vector<2x32xf32>
    %34 = tpu.matmul %33, %0, %cst_12 {dimension_numbers = #tpu.dot_dimension_numbers<[1], [0], [0], [1], [0, 0, 1, 1], [], []>} : vector<2x32xf32>, vector<32x32xf32>, vector<2x32xf32> -> vector<2x32xf32>
    %35 = arith.addf %11, %34 : vector<2x32xf32>
    %36 = math.tanh %35 : vector<2x32xf32>
    %cst_13 = arith.constant dense<0.000000e+00> : vector<2x32xf32>
    %37 = tpu.matmul %36, %0, %cst_13 {dimension_numbers = #tpu.dot_dimension_numbers<[1], [0], [0], [1], [0, 0, 1, 1], [], []>} : vector<2x32xf32>, vector<32x32xf32>, vector<2x32xf32> -> vector<2x32xf32>
    %38 = arith.addf %14, %37 : vector<2x32xf32>
    %39 = math.tanh %38 : vector<2x32xf32>
    %40 = tpu.concatenate %36, %33 in 1 : vector<2x32xf32>, vector<2x32xf32> -> vector<2x64xf32>
    %cst_14 = arith.constant dense<0.000000e+00> : vector<2x32xf32>
    %41 = tpu.matmul %40, %1, %cst_14 {dimension_numbers = #tpu.dot_dimension_numbers<[1], [0], [0], [1], [0, 0, 1, 1], [], []>} : vector<2x64xf32>, vector<64x32xf32>, vector<2x32xf32> -> vector<2x32xf32>
    %42 = vector.broadcast %2 : vector<1x32xf32> to vector<2x32xf32>
    %43 = arith.addf %41, %42 : vector<2x32xf32>
    %44 = math.tanh %43 : vector<2x32xf32>
    %cst_15 = arith.constant dense<0.000000e+00> : vector<2x32xf32>
    %45 = tpu.matmul %39, %0, %cst_15 {dimension_numbers = #tpu.dot_dimension_numbers<[1], [0], [0], [1], [0, 0, 1, 1], [], []>} : vector<2x32xf32>, vector<32x32xf32>, vector<2x32xf32> -> vector<2x32xf32>
    %46 = arith.addf %17, %45 : vector<2x32xf32>
    %47 = math.tanh %46 : vector<2x32xf32>
    %48 = tpu.concatenate %39, %44 in 1 : vector<2x32xf32>, vector<2x32xf32> -> vector<2x64xf32>
    %cst_16 = arith.constant dense<0.000000e+00> : vector<2x32xf32>
    %49 = tpu.matmul %48, %1, %cst_16 {dimension_numbers = #tpu.dot_dimension_numbers<[1], [0], [0], [1], [0, 0, 1, 1], [], []>} : vector<2x64xf32>, vector<64x32xf32>, vector<2x32xf32> -> vector<2x32xf32>
    %50 = vector.broadcast %2 : vector<1x32xf32> to vector<2x32xf32>
    %51 = arith.addf %49, %50 : vector<2x32xf32>
    %52 = math.tanh %51 : vector<2x32xf32>
    %cst_17 = arith.constant dense<0.000000e+00> : vector<2x32xf32>
    %53 = tpu.matmul %47, %0, %cst_17 {dimension_numbers = #tpu.dot_dimension_numbers<[1], [0], [0], [1], [0, 0, 1, 1], [], []>} : vector<2x32xf32>, vector<32x32xf32>, vector<2x32xf32> -> vector<2x32xf32>
    %54 = arith.addf %20, %53 : vector<2x32xf32>
    %55 = math.tanh %54 : vector<2x32xf32>
    %56 = tpu.concatenate %47, %52 in 1 : vector<2x32xf32>, vector<2x32xf32> -> vector<2x64xf32>
    %cst_18 = arith.constant dense<0.000000e+00> : vector<2x32xf32>
    %57 = tpu.matmul %56, %1, %cst_18 {dimension_numbers = #tpu.dot_dimension_numbers<[1], [0], [0], [1], [0, 0, 1, 1], [], []>} : vector<2x64xf32>, vector<64x32xf32>, vector<2x32xf32> -> vector<2x32xf32>
    %58 = vector.broadcast %2 : vector<1x32xf32> to vector<2x32xf32>
    %59 = arith.addf %57, %58 : vector<2x32xf32>
    %60 = math.tanh %59 : vector<2x32xf32>
    %cst_19 = arith.constant dense<0.000000e+00> : vector<2x32xf32>
    %61 = tpu.matmul %55, %0, %cst_19 {dimension_numbers = #tpu.dot_dimension_numbers<[1], [0], [0], [1], [0, 0, 1, 1], [], []>} : vector<2x32xf32>, vector<32x32xf32>, vector<2x32xf32> -> vector<2x32xf32>
    %62 = arith.addf %23, %61 : vector<2x32xf32>
    %63 = math.tanh %62 : vector<2x32xf32>
    %64 = tpu.concatenate %55, %60 in 1 : vector<2x32xf32>, vector<2x32xf32> -> vector<2x64xf32>
    %cst_20 = arith.constant dense<0.000000e+00> : vector<2x32xf32>
    %65 = tpu.matmul %64, %1, %cst_20 {dimension_numbers = #tpu.dot_dimension_numbers<[1], [0], [0], [1], [0, 0, 1, 1], [], []>} : vector<2x64xf32>, vector<64x32xf32>, vector<2x32xf32> -> vector<2x32xf32>
    %66 = vector.broadcast %2 : vector<1x32xf32> to vector<2x32xf32>
    %67 = arith.addf %65, %66 : vector<2x32xf32>
    %68 = math.tanh %67 : vector<2x32xf32>
    %cst_21 = arith.constant dense<0.000000e+00> : vector<2x32xf32>
    %69 = tpu.matmul %63, %0, %cst_21 {dimension_numbers = #tpu.dot_dimension_numbers<[1], [0], [0], [1], [0, 0, 1, 1], [], []>} : vector<2x32xf32>, vector<32x32xf32>, vector<2x32xf32> -> vector<2x32xf32>
    %70 = arith.addf %26, %69 : vector<2x32xf32>
    %71 = math.tanh %70 : vector<2x32xf32>
    %72 = tpu.concatenate %63, %68 in 1 : vector<2x32xf32>, vector<2x32xf32> -> vector<2x64xf32>
    %cst_22 = arith.constant dense<0.000000e+00> : vector<2x32xf32>
    %73 = tpu.matmul %72, %1, %cst_22 {dimension_numbers = #tpu.dot_dimension_numbers<[1], [0], [0], [1], [0, 0, 1, 1], [], []>} : vector<2x64xf32>, vector<64x32xf32>, vector<2x32xf32> -> vector<2x32xf32>
    %74 = vector.broadcast %2 : vector<1x32xf32> to vector<2x32xf32>
    %75 = arith.addf %73, %74 : vector<2x32xf32>
    %76 = math.tanh %75 : vector<2x32xf32>
    %cst_23 = arith.constant dense<0.000000e+00> : vector<2x32xf32>
    %77 = tpu.matmul %71, %0, %cst_23 {dimension_numbers = #tpu.dot_dimension_numbers<[1], [0], [0], [1], [0, 0, 1, 1], [], []>} : vector<2x32xf32>, vector<32x32xf32>, vector<2x32xf32> -> vector<2x32xf32>
    %78 = arith.addf %29, %77 : vector<2x32xf32>
    %79 = math.tanh %78 : vector<2x32xf32>
    %80 = tpu.concatenate %71, %76 in 1 : vector<2x32xf32>, vector<2x32xf32> -> vector<2x64xf32>
    %cst_24 = arith.constant dense<0.000000e+00> : vector<2x32xf32>
    %81 = tpu.matmul %80, %1, %cst_24 {dimension_numbers = #tpu.dot_dimension_numbers<[1], [0], [0], [1], [0, 0, 1, 1], [], []>} : vector<2x64xf32>, vector<64x32xf32>, vector<2x32xf32> -> vector<2x32xf32>
    %82 = vector.broadcast %2 : vector<1x32xf32> to vector<2x32xf32>
    %83 = arith.addf %81, %82 : vector<2x32xf32>
    %84 = math.tanh %83 : vector<2x32xf32>
    %cst_25 = arith.constant dense<0.000000e+00> : vector<2x32xf32>
    %85 = tpu.matmul %79, %0, %cst_25 {dimension_numbers = #tpu.dot_dimension_numbers<[1], [0], [0], [1], [0, 0, 1, 1], [], []>} : vector<2x32xf32>, vector<32x32xf32>, vector<2x32xf32> -> vector<2x32xf32>
    %86 = arith.addf %32, %85 : vector<2x32xf32>
    %87 = math.tanh %86 : vector<2x32xf32>
    %88 = tpu.concatenate %79, %84 in 1 : vector<2x32xf32>, vector<2x32xf32> -> vector<2x64xf32>
    %cst_26 = arith.constant dense<0.000000e+00> : vector<2x32xf32>
    %89 = tpu.matmul %88, %1, %cst_26 {dimension_numbers = #tpu.dot_dimension_numbers<[1], [0], [0], [1], [0, 0, 1, 1], [], []>} : vector<2x64xf32>, vector<64x32xf32>, vector<2x32xf32> -> vector<2x32xf32>
    %90 = vector.broadcast %2 : vector<1x32xf32> to vector<2x32xf32>
    %91 = arith.addf %89, %90 : vector<2x32xf32>
    %92 = math.tanh %91 : vector<2x32xf32>
    %93 = tpu.concatenate %87, %92 in 1 : vector<2x32xf32>, vector<2x32xf32> -> vector<2x64xf32>
    %cst_27 = arith.constant dense<0.000000e+00> : vector<2x32xf32>
    %94 = tpu.matmul %93, %1, %cst_27 {dimension_numbers = #tpu.dot_dimension_numbers<[1], [0], [0], [1], [0, 0, 1, 1], [], []>} : vector<2x64xf32>, vector<64x32xf32>, vector<2x32xf32> -> vector<2x32xf32>
    %95 = vector.broadcast %2 : vector<1x32xf32> to vector<2x32xf32>
    %96 = arith.addf %94, %95 : vector<2x32xf32>
    %97 = math.tanh %96 : vector<2x32xf32>
    %98 = tpu.concatenate %87, %97 in 0 : vector<2x32xf32>, vector<2x32xf32> -> vector<4x32xf32>
    %c0_28 = arith.constant 0 : index
    %c0_29 = arith.constant 0 : index
    %99 = vector.load %arg9[%c0_28, %c0_29] : memref<4x32xf32, #tpu.memory_space<vmem>>, vector<4x32xf32>
    tpu.vector_store %arg9[%c0_28, %c0_29], %98 {strides = array<i32>} : memref<4x32xf32, #tpu.memory_space<vmem>>, vector<4x32xf32>,
    %100 = vector.extract_strided_slice %44 {offsets = [0, 0], sizes = [1, 32], strides = [1, 1]} : vector<2x32xf32> to vector<1x32xf32>
    %101 = vector.extract_strided_slice %52 {offsets = [0, 0], sizes = [1, 32], strides = [1, 1]} : vector<2x32xf32> to vector<1x32xf32>
    %102 = vector.extract_strided_slice %60 {offsets = [0, 0], sizes = [1, 32], strides = [1, 1]} : vector<2x32xf32> to vector<1x32xf32>
    %103 = vector.extract_strided_slice %68 {offsets = [0, 0], sizes = [1, 32], strides = [1, 1]} : vector<2x32xf32> to vector<1x32xf32>
    %104 = vector.extract_strided_slice %76 {offsets = [0, 0], sizes = [1, 32], strides = [1, 1]} : vector<2x32xf32> to vector<1x32xf32>
    %105 = vector.extract_strided_slice %84 {offsets = [0, 0], sizes = [1, 32], strides = [1, 1]} : vector<2x32xf32> to vector<1x32xf32>
    %106 = vector.extract_strided_slice %92 {offsets = [0, 0], sizes = [1, 32], strides = [1, 1]} : vector<2x32xf32> to vector<1x32xf32>
    %107 = vector.extract_strided_slice %97 {offsets = [0, 0], sizes = [1, 32], strides = [1, 1]} : vector<2x32xf32> to vector<1x32xf32>
    %108 = vector.extract_strided_slice %44 {offsets = [1, 0], sizes = [1, 32], strides = [1, 1]} : vector<2x32xf32> to vector<1x32xf32>
    %109 = vector.extract_strided_slice %52 {offsets = [1, 0], sizes = [1, 32], strides = [1, 1]} : vector<2x32xf32> to vector<1x32xf32>
    %110 = vector.extract_strided_slice %60 {offsets = [1, 0], sizes = [1, 32], strides = [1, 1]} : vector<2x32xf32> to vector<1x32xf32>
    %111 = vector.extract_strided_slice %68 {offsets = [1, 0], sizes = [1, 32], strides = [1, 1]} : vector<2x32xf32> to vector<1x32xf32>
    %112 = vector.extract_strided_slice %76 {offsets = [1, 0], sizes = [1, 32], strides = [1, 1]} : vector<2x32xf32> to vector<1x32xf32>
    %113 = vector.extract_strided_slice %84 {offsets = [1, 0], sizes = [1, 32], strides = [1, 1]} : vector<2x32xf32> to vector<1x32xf32>
    %114 = vector.extract_strided_slice %92 {offsets = [1, 0], sizes = [1, 32], strides = [1, 1]} : vector<2x32xf32> to vector<1x32xf32>
    %115 = vector.extract_strided_slice %97 {offsets = [1, 0], sizes = [1, 32], strides = [1, 1]} : vector<2x32xf32> to vector<1x32xf32>
    %116 = tpu.concatenate %100, %101, %102, %103, %104, %105, %106, %107, %108, %109, %110, %111, %112, %113, %114, %115 in 0 : vector<1x32xf32>, vector<1x32xf32>, vector<1x32xf32>, vector<1x32xf32>, vector<1x32xf32>, vector<1x32xf32>, vector<1x32xf32>, vector<1x32xf32>, vector<1x32xf32>, vector<1x32xf32>, vector<1x32xf32>, vector<1x32xf32>, vector<1x32xf32>, vector<1x32xf32>, vector<1x32xf32>, vector<1x32xf32> -> vector<16x32xf32>
    %c0_30 = arith.constant 0 : index
    %c0_31 = arith.constant 0 : index
    %117 = vector.load %arg6[%c0_30, %c0_31] : memref<32x2xf32, #tpu.memory_space<vmem>>, vector<32x2xf32>
    %cst_32 = arith.constant dense<0.000000e+00> : vector<16x2xf32>
    %118 = tpu.matmul %116, %117, %cst_32 {dimension_numbers = #tpu.dot_dimension_numbers<[1], [0], [0], [1], [0, 0, 1, 1], [], []>} : vector<16x32xf32>, vector<32x2xf32>, vector<16x2xf32> -> vector<16x2xf32>
    %c0_33 = arith.constant 0 : index
    %c0_34 = arith.constant 0 : index
    %119 = vector.load %arg7[%c0_33, %c0_34] : memref<1x2xf32, #tpu.memory_space<vmem>>, vector<1x2xf32>
    %120 = vector.broadcast %119 : vector<1x2xf32> to vector<16x2xf32>
    %121 = arith.addf %118, %120 : vector<16x2xf32>
    %c0_35 = arith.constant 0 : index
    %c0_36 = arith.constant 0 : index
    %122 = vector.load %arg8[%c0_35, %c0_36] : memref<16x2xf32, #tpu.memory_space<vmem>>, vector<16x2xf32>
    tpu.vector_store %arg8[%c0_35, %c0_36], %121 {strides = array<i32>} : memref<16x2xf32, #tpu.memory_space<vmem>>, vector<16x2xf32>,
    return
  }
}

</mosaic_0001>

<bundles_post_ra>
// kernel: rnn_model_forward.1
= control target key start
LH: loop header
LB: loop body
LE: loop exit
PB: predicated region body
PF: predicated region fallthrough
CT: control target
= control target key end

     0   :  { %vm53_vm0 = vcmask 130048   ;;  %s1080_s0 = inlined_call_operand.vmem [shape: f32[16,16], index: 0, kind: input, shape index: {}]   ;;  %s1081_s1 = inlined_call_operand.vmem [shape: f32[16,32], index: 1, kind: input, shape index: {}]   ;;  %s1082_s2 = inlined_call_operand.vmem [shape: f32[32,32], index: 2, kind: input, shape index: {}]   ;;  %s1083_s3 = inlined_call_operand.vmem [shape: f32[1,32], index: 3, kind: input, shape index: {}]   ;;  %s1084_s4 = inlined_call_operand.vmem [shape: f32[64,32], index: 4, kind: input, shape index: {}]   ;;  %s1085_s5 = inlined_call_operand.vmem [shape: f32[1,32], index: 5, kind: input, shape index: {}]   ;;  %s1086_s6 = inlined_call_operand.vmem [shape: f32[32,2], index: 6, kind: input, shape index: {}]   ;;  %s1087_s7 = inlined_call_operand.vmem [shape: f32[1,2], index: 7, kind: input, shape index: {}]   ;;  %s1088_s8 = inlined_call_operand.vmem [shape: f32[16,2], index: 8, kind: output, shape index: {0}]   ;;  %s1089_s9 = inlined_call_operand.hbm [shape: f32[4,32], index: 9, kind: output, shape index: {1}]  }
   0x1   :  { %v48_v0 = vld [vmem:[%s1081_s1 + $0x8] sm:$0xff]  ;;  %v47_v1 = vld [vmem:[%s1081_s1] sm:$0xff]  ;;  %v817_v3 = vld [vmem:[%s1082_s2 + $0x18] sm:$0xff] }
   0x2   :  { %74 = vmatpush.msra.mxu0 %v48_v0  ;;  %v45_v2 = vld [vmem:[%s1080_s0] sm:$0xff]  ;;  %v822_v4 = vld [vmem:[%s1082_s2 + $0x10] sm:$0xff]  ;;  %138 = vmatpush.msra.mxu1 %v817_v3  ;;  %v829_v5 = vld [vmem:[%s1082_s2 + $0x8] sm:$0xff] }
   0x3   :  { %163 = vmatpush.msra.mxu2 %v817_v3 }
   0x4   :  { %75 = vmatpush.msra.mxu0 %v47_v1  ;;  %139 = vmatpush.msra.mxu1 %v822_v4 }
   0x5   :  { %669 = vmatmul.msk.f32.vlgmr.msra.gmra.mxu0 %vm53_vm0, %v45_v2 }
   0x6   :  { %15 = vsyncpa [#allocation3], 0  ;;  %v836_v6 = vld [vmem:[%s1082_s2] sm:$0xff]  ;;  %164 = vmatpush.msra.mxu2 %v822_v4  ;;  %140 = vmatpush.msra.mxu1 %v829_v5  ;;  %v46_v7 = vld [vmem:[%s1080_s0 + $0x8] sm:$0xff]  ;;  %v752_v8 = vmov 0.0   ;;  %vm86_vm1 = vcmask 1040384  }
   0x7   :  { %v858_v9 = vld [vmem:[%s1084_s4 + $0x38] sm:$0xff]  ;;  %v864_v10 = vld [vmem:[%s1084_s4 + $0x30] sm:$0xff]  ;;  %v873_v11 = vld [vmem:[%s1084_s4 + $0x28] sm:$0xff]  ;;  %vm122_vm2 = vcmask 261120   ;;  %vm177_vm3 = vcmask 523264   ;;  %s753_s1 = smov 32  }
   0x8   :  { %165 = vmatpush.msra.mxu2 %v829_v5  ;;  %141 = vmatpush.msra.mxu1 %v836_v6  ;;  %v881_v12 = vld [vmem:[%s1084_s4 + $0x20] sm:$0xff]  ;;  %v889_v13 = vld [vmem:[%s1084_s4 + $0x18] sm:$0xff]  ;;  %v894_v14 = vld [vmem:[%s1084_s4 + $0x10] sm:$0xff]  ;;  %vm558_vm4 = vcmask 1041408   ;;  %vm592_vm5 = vcmask 1042432   ;;  %vm594_vm6 = vcmask 1043456  }
   0x9   :  { %142 = vmatmul.f32.vlgmr.msra.gmra.mxu1 %v752_v8  ;;  %189 = vmatpush.msra.mxu3 %v858_v9  ;;  %v902_v15 = vld [vmem:[%s1084_s4 + $0x8] sm:$0xff]  ;;  %v913_v16 = vld [vmem:[%s1084_s4] sm:$0xff]  ;;  %vm596_vm7 = vcmask 1044480   ;;  %vm598_vm8 = vcmask 1045504   ;;  %vm600_vm9 = vcmask 1046528   ;;  %vm560_vm10 = vcmask 257024  }
   0xa   :  { %166 = vmatpush.msra.mxu2 %v836_v6  ;;  %217 = vmatpush.msrb.mxu1 %v817_v3  ;;  %v691_v18 = vld [vmem:[%s1083_s3] ss:$0 sm:$0xff]  ;;  %s658_s27 = sshll.u32 %s1089_s9, 4  ;;  %vm646_vm11 = vcmask 15360   ;;  %s659_s27 = int_to_ptr.hbm [resolvable:$true] %s658_s27 }
   0xb   :  { %243 = vmatpush.msrb.mxu0 %v858_v9  ;;  %190 = vmatpush.msra.mxu3 %v864_v10  ;;  %v966_v48 = vld [vmem:[%s1085_s5] ss:$0 sm:$0xff] }
   0xc   :  { %271 = vmatpush.msrb.mxu2 %v817_v3  ;;  %218 = vmatpush.msrb.mxu1 %v822_v4 }
   0xd   :  { %670 = vmatmul.msk.f32.gmra.mxu0 %vm53_vm0, %v46_v7  ;;  %191 = vmatpush.msra.mxu3 %v873_v11 }
   0xe   :  { %272 = vmatpush.msrb.mxu2 %v822_v4  ;;  %219 = vmatpush.msrb.mxu1 %v829_v5 }
   0xf   :  { %244 = vmatpush.msrb.mxu0 %v864_v10  ;;  %192 = vmatpush.msra.mxu3 %v881_v12 }
  0x10   :  { %273 = vmatpush.msrb.mxu2 %v829_v5  ;;  %220 = vmatpush.msrb.mxu1 %v836_v6 }
  0x11   :  { %245 = vmatpush.msrb.mxu0 %v873_v11  ;;  %193 = vmatpush.msra.mxu3 %v889_v13 }
  0x12   :  { %274 = vmatpush.msrb.mxu2 %v836_v6  ;;  %297 = vmatpush.msra.mxu1 %v858_v9 }
  0x13   :  { %246 = vmatpush.msrb.mxu0 %v881_v12  ;;  %194 = vmatpush.msra.mxu3 %v894_v14 }
  0x14   :  { %298 = vmatpush.msra.mxu1 %v864_v10 }
  0x15   :  { %247 = vmatpush.msrb.mxu0 %v889_v13  ;;  %195 = vmatpush.msra.mxu3 %v902_v15 }
  0x16   :  { %299 = vmatpush.msra.mxu1 %v873_v11 }
  0x17   :  { %248 = vmatpush.msrb.mxu0 %v894_v14  ;;  %196 = vmatpush.msra.mxu3 %v913_v16 }
  0x18   :  { %300 = vmatpush.msra.mxu1 %v881_v12 }
  0x19   :  { %249 = vmatpush.msrb.mxu0 %v902_v15  ;;  %351 = vmatpush.msrb.mxu3 %v858_v9 }
  0x1a   :  { %301 = vmatpush.msra.mxu1 %v889_v13 }
  0x1b   :  { %250 = vmatpush.msrb.mxu0 %v913_v16  ;;  %352 = vmatpush.msrb.mxu3 %v864_v10 }
  0x1c   :  { %302 = vmatpush.msra.mxu1 %v894_v14 }
  0x1d   :  { %379 = vmatpush.msra.mxu0 %v817_v3  ;;  %353 = vmatpush.msrb.mxu3 %v873_v11 }
  0x1e   :  { %303 = vmatpush.msra.mxu1 %v902_v15 }
  0x1f   :  { %380 = vmatpush.msra.mxu0 %v822_v4  ;;  %354 = vmatpush.msrb.mxu3 %v881_v12 }
  0x20   :  { %304 = vmatpush.msra.mxu1 %v913_v16 }
  0x21   :  { %381 = vmatpush.msra.mxu0 %v829_v5  ;;  %355 = vmatpush.msrb.mxu3 %v889_v13 }
  0x23   :  { %382 = vmatpush.msra.mxu0 %v836_v6  ;;  %356 = vmatpush.msrb.mxu3 %v894_v14 }
  0x25   :  { %357 = vmatpush.msrb.mxu3 %v902_v15 }
  0x27   :  { %358 = vmatpush.msrb.mxu3 %v913_v16 }
  0x82   :  { %v77_v17 = vpop.f32.mrf.mxu0 }
  0x83   :  { %v78_v19 = vadd.f32 %v691_v18, %v77_v17 }
  0x85   :  { %v89_v22 = vrot.slane %v78_v19, 1  ;;  %v92_v23 = vrot.slane %v78_v19, 2  ;;  %v97_v24 = vrot.slane %v78_v19, 3  ;;  %v102_v25 = vrot.slane %v78_v19, 4 }
  0x86   :  { %v107_v26 = vrot.slane %v78_v19, 5  ;;  %v112_v27 = vrot.slane %v78_v19, 6  ;;  %v143_v29 = vpop.f32.mrf.mxu1  ;;  %v117_v40 = vrot.slane %v78_v19, 7 }
  0x8a   :  { %v80_v20 = vpop.f32.mrf.mxu0 }
  0x8b   :  { %v81_v21 = vadd.f32 %v691_v18, %v80_v20 }
  0x8d   :  { %v84_v28 = vrot.slane %v81_v21, 7  ;;  %v91_v30 = vsel %vm86_vm1, %v89_v22, %v81_v21  ;;  %v94_v31 = vrot.slane %v81_v21, 1  ;;  %v99_v32 = vrot.slane %v81_v21, 2 }
  0x8e   :  { %v104_v33 = vrot.slane %v81_v21, 3  ;;  %v109_v34 = vrot.slane %v81_v21, 4  ;;  %v114_v35 = vrot.slane %v81_v21, 5  ;;  %v119_v36 = vrot.slane %v81_v21, 6 }
  0x8f   :  { %v87_v37 = vsel %vm86_vm1, %v78_v19, %v84_v28  ;;  %v96_v38 = vsel %vm86_vm1, %v92_v23, %v94_v31  ;;  %v938_v39 = vsel %vm86_vm1, %v97_v24, %v99_v32 }
  0x90   :  { %v146_v41 = vadd.f32 %v143_v29, %v87_v37  ;;  %v941_v42 = vsel %vm86_vm1, %v102_v25, %v104_v33  ;;  %v944_v43 = vsel %vm86_vm1, %v107_v26, %v109_v34  ;;  %v947_v44 = vsel %vm86_vm1, %v112_v27, %v114_v35 }
  0x91   :  { %v950_v45 = vsel %vm86_vm1, %v117_v40, %v119_v36 }
  0x92   :  { %694 = vtanh.f32 %v146_v41 }
  0x98   :  { %v695_v46 = vpop.eup %694 }
  0x99   :  { %671 = vmatmul.msk.f32.vlgmr.msra.gmra.mxu2 %vm122_vm2, %v695_v46  ;;  %v173_v47 = vsel %vm122_vm2, %v695_v46, 0.0 }
  0x9a   :  { %672 = vmatmul.msk.f32.vlgmr.msra.gmra.mxu3 %vm177_vm3, %v173_v47  ;;  %325 = vmatpush.msra.mxu2 %v817_v3 }
  0x9b   :  { %487 = vmatpush.msra.mxu3 %v817_v3 }
  0x9c   :  { %326 = vmatpush.msra.mxu2 %v822_v4 }
  0x9d   :  { %488 = vmatpush.msra.mxu3 %v822_v4 }
  0x9e   :  { %327 = vmatpush.msra.mxu2 %v829_v5 }
  0x9f   :  { %489 = vmatpush.msra.mxu3 %v829_v5 }
  0xa0   :  { %328 = vmatpush.msra.mxu2 %v836_v6 }
  0xa1   :  { %490 = vmatpush.msra.mxu3 %v836_v6 }
 0x11c   :  { %v168_v49 = vpop.f32.mrf.mxu2 }
 0x11d   :  { %v171_v50 = vadd.f32 %v168_v49, %v91_v30  ;;  %v198_v51 = vpop.f32.mrf.mxu3 }
 0x11e   :  { %v199_v52 = vadd.f32 %v966_v48, %v198_v51 }
 0x11f   :  { %696 = vtanh.f32 %v171_v50 }
 0x120   :  { %698 = vtanh.f32 %v199_v52 }
 0x125   :  { %v697_v53 = vpop.eup %696 }
 0x126   :  { %v969_v54 = vpop.eup %698  ;;  %673 = vmatmul.msk.f32.vlgmr.msrb.gmra.mxu1 %vm122_vm2, %v697_v53 }
 0x127   :  { %228 = vrot.lane.b32.xlu0 %v969_v54, %s753_s1  ;;  %459 = vmatpush.msrb.mxu1 %v858_v9 }
 0x129   :  { %460 = vmatpush.msrb.mxu1 %v864_v10 }
 0x12b   :  { %461 = vmatpush.msrb.mxu1 %v873_v11 }
 0x12d   :  { %462 = vmatpush.msrb.mxu1 %v881_v12 }
 0x12f   :  { %463 = vmatpush.msrb.mxu1 %v889_v13 }
 0x131   :  { %464 = vmatpush.msrb.mxu1 %v894_v14 }
 0x133   :  { %465 = vmatpush.msrb.mxu1 %v902_v15 }
 0x135   :  { %466 = vmatpush.msrb.mxu1 %v913_v16 }
 0x199   :  { %v229_v55 = vpop.permute.xlu0 %228 }
 0x19a   :  { %v231_v56 = vsel %vm122_vm2, %v697_v53, %v229_v55 }
 0x19b   :  { %674 = vmatmul.msk.f32.vlgmr.msrb.gmra.mxu0 %vm177_vm3, %v231_v56 }
 0x19c   :  { %433 = vmatpush.msrb.mxu0 %v817_v3 }
 0x19e   :  { %434 = vmatpush.msrb.mxu0 %v822_v4 }
 0x1a0   :  { %435 = vmatpush.msrb.mxu0 %v829_v5 }
 0x1a2   :  { %436 = vmatpush.msrb.mxu0 %v836_v6 }
 0x1a3   :  { %v222_v57 = vpop.f32.mrf.mxu1 }
 0x1a4   :  { %v225_v58 = vadd.f32 %v222_v57, %v96_v38 }
 0x1a6   :  { %700 = vtanh.f32 %v225_v58 }
 0x1ac   :  { %v701_v59 = vpop.eup %700 }
 0x1ad   :  { %675 = vmatmul.msk.f32.vlgmr.msrb.gmra.mxu2 %vm122_vm2, %v701_v59 }
 0x1ae   :  { %405 = vmatpush.msrb.mxu2 %v858_v9 }
 0x1b0   :  { %406 = vmatpush.msrb.mxu2 %v864_v10 }
 0x1b2   :  { %407 = vmatpush.msrb.mxu2 %v873_v11 }
 0x1b4   :  { %408 = vmatpush.msrb.mxu2 %v881_v12 }
 0x1b6   :  { %409 = vmatpush.msrb.mxu2 %v889_v13 }
 0x1b8   :  { %410 = vmatpush.msrb.mxu2 %v894_v14 }
 0x1ba   :  { %411 = vmatpush.msrb.mxu2 %v902_v15 }
 0x1bc   :  { %412 = vmatpush.msrb.mxu2 %v913_v16 }
 0x218   :  { %v252_v60 = vpop.f32.mrf.mxu0 }
 0x219   :  { %v253_v61 = vadd.f32 %v966_v48, %v252_v60 }
 0x21b   :  { %702 = vtanh.f32 %v253_v61 }
 0x221   :  { %v703_v62 = vpop.eup %702 }
 0x222   :  { %282 = vrot.lane.b32.xlu0 %v703_v62, %s753_s1  ;;  %v562_v17 = vrot.slane %v703_v62, 7 }
 0x230   :  { %v276_v63 = vpop.f32.mrf.mxu2 }
 0x231   :  { %v279_v0 = vadd.f32 %v276_v63, %v938_v39 }
 0x233   :  { %704 = vtanh.f32 %v279_v0 }
 0x239   :  { %v705_v1 = vpop.eup %704 }
 0x23a   :  { %677 = vmatmul.msk.f32.vlgmr.msra.gmra.mxu2 %vm122_vm2, %v705_v1 }
 0x23b   :  { %542 = vmatpush.msra.mxu2 %v858_v9 }
 0x23d   :  { %543 = vmatpush.msra.mxu2 %v864_v10 }
 0x23f   :  { %544 = vmatpush.msra.mxu2 %v873_v11 }
 0x241   :  { %545 = vmatpush.msra.mxu2 %v881_v12 }
 0x243   :  { %546 = vmatpush.msra.mxu2 %v889_v13 }
 0x245   :  { %547 = vmatpush.msra.mxu2 %v894_v14 }
 0x247   :  { %548 = vmatpush.msra.mxu2 %v902_v15 }
 0x249   :  { %549 = vmatpush.msra.mxu2 %v913_v16 }
 0x294   :  { %v283_v2 = vpop.permute.xlu0 %282 }
 0x295   :  { %v285_v3 = vsel %vm122_vm2, %v701_v59, %v283_v2 }
 0x296   :  { %676 = vmatmul.msk.f32.vlgmr.msra.gmra.mxu1 %vm177_vm3, %v285_v3  ;;  %v612_v3 = vld [vmem:[%s1086_s6 + $0x18] sm:$0xff] }
 0x2bd   :  { %v330_v4 = vpop.f32.mrf.mxu2 }
 0x2be   :  { %v333_v5 = vadd.f32 %v330_v4, %v941_v42  ;;  %v611_v4 = vld [vmem:[%s1086_s6 + $0x10] sm:$0xff] }
 0x2c0   :  { %706 = vtanh.f32 %v333_v5  ;;  %v609_v5 = vld [vmem:[%s1086_s6] sm:$0xff] }
 0x2c6   :  { %v707_v6 = vpop.eup %706 }
 0x2c7   :  { %679 = vmatmul.msk.f32.vlgmr.msra.gmra.mxu0 %vm122_vm2, %v707_v6 }
 0x2c8   :  { %513 = vmatpush.msra.mxu0 %v858_v9 }
 0x2ca   :  { %514 = vmatpush.msra.mxu0 %v864_v10  ;;  %v576_v10 = vrot.slane %v969_v54, 1 }
 0x2cc   :  { %515 = vmatpush.msra.mxu0 %v873_v11 }
 0x2ce   :  { %516 = vmatpush.msra.mxu0 %v881_v12  ;;  %v590_v12 = vsel %vm86_vm1, %v969_v54, %v562_v17 }
 0x2d0   :  { %517 = vmatpush.msra.mxu0 %v889_v13  ;;  %v602_v13 = vsel %vm86_vm1, %v576_v10, %v703_v62 }
 0x2d2   :  { %518 = vmatpush.msra.mxu0 %v894_v14 }
 0x2d4   :  { %519 = vmatpush.msra.mxu0 %v902_v15 }
 0x2d6   :  { %520 = vmatpush.msra.mxu0 %v913_v16 }
 0x313   :  { %v306_v7 = vpop.f32.mrf.mxu1 }
 0x314   :  { %v307_v8 = vadd.f32 %v966_v48, %v306_v7 }
 0x316   :  { %708 = vtanh.f32 %v307_v8 }
 0x31c   :  { %v709_v9 = vpop.eup %708 }
 0x31d   :  { %v564_v11 = vrot.slane %v709_v9, 6  ;;  %v578_v18 = vrot.slane %v709_v9, 7  ;;  %336 = vrot.lane.b32.xlu1 %v709_v9, %s753_s1 }
 0x31f   :  { %v591_v14 = vsel %vm558_vm4, %v590_v12, %v564_v11  ;;  %v603_v15 = vsel %vm558_vm4, %v602_v13, %v578_v18 }
 0x344   :  { %v384_v16 = vpop.f32.mrf.mxu0 }
 0x345   :  { %v387_v19 = vadd.f32 %v384_v16, %v944_v43 }
 0x347   :  { %710 = vtanh.f32 %v387_v19 }
 0x34d   :  { %v711_v20 = vpop.eup %710 }
 0x34e   :  { %681 = vmatmul.msk.f32.vlgmr.msrb.gmra.mxu0 %vm122_vm2, %v711_v20 }
 0x38f   :  { %v337_v21 = vpop.permute.xlu1 %336 }
 0x390   :  { %v339_v22 = vsel %vm122_vm2, %v705_v1, %v337_v21 }
 0x391   :  { %678 = vmatmul.msk.f32.vlgmr.msrb.gmra.mxu3 %vm177_vm3, %v339_v22 }
 0x392   :  { %635 = vmatpush.msrb.mxu3 %v612_v3 }
 0x394   :  { %636 = vmatpush.msrb.mxu3 %v611_v4 }
 0x3cb   :  { %v438_v23 = vpop.f32.mrf.mxu0 }
 0x3cc   :  { %v441_v24 = vadd.f32 %v438_v23, %v947_v44 }
 0x3ce   :  { %712 = vtanh.f32 %v441_v24 }
 0x3d4   :  { %v713_v25 = vpop.eup %712 }
 0x3d5   :  { %683 = vmatmul.msk.f32.vlgmr.msra.gmra.mxu3 %vm122_vm2, %v713_v25 }
 0x414   :  { %v360_v26 = vpop.f32.mrf.mxu3 }
 0x415   :  { %v361_v27 = vadd.f32 %v966_v48, %v360_v26 }
 0x417   :  { %714 = vtanh.f32 %v361_v27 }
 0x41d   :  { %v715_v28 = vpop.eup %714 }
 0x41e   :  { %v566_v29 = vrot.slane %v715_v28, 5  ;;  %390 = vrot.lane.b32.xlu1 %v715_v28, %s753_s1  ;;  %v580_v30 = vrot.slane %v715_v28, 6 }
 0x420   :  { %v593_v31 = vsel %vm592_vm5, %v591_v14, %v566_v29  ;;  %v604_v32 = vsel %vm592_vm5, %v603_v15, %v580_v30 }
 0x458   :  { %v492_v62 = vpop.f32.mrf.mxu3 }
 0x459   :  { %v495_v63 = vadd.f32 %v492_v62, %v950_v45  ;;  %v610_v45 = vld [vmem:[%s1086_s6 + $0x8] sm:$0xff]  ;;  %s754_s6 = smov [#allocation2]  }
 0x45a   :  { %637 = vmatpush.msrb.mxu3 %v610_v45  ;;  %s656_s24 = sshll.u32 %s754_s6, 4  ;;  %s657_s24 = int_to_ptr.vmem [resolvable:$true] %s656_s24 }
 0x45c   :  { %638 = vmatpush.msrb.mxu3 %v609_v5 }
 0x490   :  { %v391_v33 = vpop.permute.xlu1 %390 }
 0x491   :  { %v393_v34 = vsel %vm122_vm2, %v707_v6, %v391_v33 }
 0x492   :  { %680 = vmatmul.msk.f32.vlgmr.msrb.gmra.mxu2 %vm177_vm3, %v393_v34 }
 0x515   :  { %v414_v35 = vpop.f32.mrf.mxu2 }
 0x516   :  { %v415_v36 = vadd.f32 %v966_v48, %v414_v35 }
 0x518   :  { %716 = vtanh.f32 %v415_v36 }
 0x51e   :  { %v717_v37 = vpop.eup %716 }
 0x51f   :  { %v568_v38 = vrot.slane %v717_v37, 4  ;;  %444 = vrot.lane.b32.xlu2 %v717_v37, %s753_s1  ;;  %v582_v39 = vrot.slane %v717_v37, 5 }
 0x521   :  { %v595_v40 = vsel %vm594_vm6, %v593_v31, %v568_v38  ;;  %v605_v41 = vsel %vm594_vm6, %v604_v32, %v582_v39 }
 0x579   :  { %v445_v42 = vpop.permute.xlu2 %444 }
 0x57a   :  { %v447_v43 = vsel %vm122_vm2, %v711_v20, %v445_v42 }
 0x57b   :  { %682 = vmatmul.msk.f32.vlgmr.msrb.gmra.mxu1 %vm177_vm3, %v447_v43 }
 0x5f8   :  { %v468_v44 = vpop.f32.mrf.mxu1 }
 0x5f9   :  { %v469_v46 = vadd.f32 %v966_v48, %v468_v44 }
 0x5fb   :  { %718 = vtanh.f32 %v469_v46 }
 0x601   :  { %v719_v47 = vpop.eup %718 }
 0x602   :  { %498 = vrot.lane.b32.xlu2 %v719_v47, %s753_s1  ;;  %v570_v49 = vrot.slane %v719_v47, 3  ;;  %v584_v50 = vrot.slane %v719_v47, 4 }
 0x604   :  { %v597_v51 = vsel %vm596_vm7, %v595_v40, %v570_v49  ;;  %v606_v52 = vsel %vm596_vm7, %v605_v41, %v584_v50 }
 0x65c   :  { %v499_v53 = vpop.permute.xlu2 %498 }
 0x65d   :  { %v501_v54 = vsel %vm122_vm2, %v713_v25, %v499_v53 }
 0x65e   :  { %684 = vmatmul.msk.f32.vlgmr.msra.gmra.mxu0 %vm177_vm3, %v501_v54 }
 0x6db   :  { %v522_v55 = vpop.f32.mrf.mxu0 }
 0x6dc   :  { %v523_v56 = vadd.f32 %v966_v48, %v522_v55 }
 0x6de   :  { %720 = vtanh.f32 %v523_v56 }
 0x6df   :  { %722 = vtanh.f32 %v495_v63 }
 0x6e4   :  { %v721_v57 = vpop.eup %720 }
 0x6e5   :  { %527 = vrot.lane.b32.xlu0 %v721_v57, %s753_s1  ;;  %v572_v58 = vrot.slane %v721_v57, 2  ;;  %v586_v59 = vrot.slane %v721_v57, 3  ;;  %v723_v0 = vpop.eup %722 }
 0x6e7   :  { %v599_v60 = vsel %vm598_vm8, %v597_v51, %v572_v58  ;;  %v607_v61 = vsel %vm598_vm8, %v606_v52, %v586_v59 }
 0x757   :  { %v528_v1 = vpop.permute.xlu0 %527 }
 0x758   :  { %v530_v2 = vsel %vm122_vm2, %v723_v0, %v528_v1 }
 0x759   :  { %685 = vmatmul.msk.f32.vlgmr.msra.gmra.mxu2 %vm177_vm3, %v530_v2 }
 0x7dc   :  { %v551_v6 = vpop.f32.mrf.mxu2 }
 0x7dd   :  { %v552_v7 = vadd.f32 %v966_v48, %v551_v6  ;;  %v693_v48 = vld [vmem:[%s1087_s7] ss:$0 sm:$0xff] }
 0x7df   :  { %724 = vtanh.f32 %v552_v7 }
 0x7e5   :  { %v725_v8 = vpop.eup %724 }
 0x7e6   :  { %v574_v17 = vrot.slane %v725_v8, 1  ;;  %v556_v9 = vrot.slane %v725_v8, 6  ;;  %v588_v18 = vrot.slane %v725_v8, 2 }
 0x7e8   :  { %v601_v10 = vsel %vm600_vm9, %v599_v60, %v574_v17  ;;  %v559_v11 = vsel %vm558_vm4, %v723_v0, %v556_v9  ;;  %v608_v12 = vsel %vm600_vm9, %v607_v61, %v588_v18 }
 0x7e9   :  { %686 = vmatmul.msk.f32.vlgmr.msrb.gmra.mxu3 %vm122_vm2, %v601_v10  ;;  %561 = vst.msk [vmem:[#allocation2] sm:$0xf] %vm560_vm10, %v559_v11 }
 0x7ea   :  { %661 = dma.vmem_to_hbm [thread:$0]  %s657_s24, 64, %s659_s27, [#allocation3]  }
 0x7f1   :  { %687 = vmatmul.msk.f32.gmra.mxu3 %vm122_vm2, %v608_v12 }
 0x86c   :  { %v640_v13 = vpop.f32.mrf.mxu3 }
 0x86d   :  { %v641_v14 = vadd.f32 %v693_v48, %v640_v13 }
 0x86f   :  { %647 = vst.msk [vmem:[%s1088_s8] sm:$0xff] %vm646_vm11, %v641_v14 }
 0x874   :  { %v643_v15 = vpop.f32.mrf.mxu3 }
 0x875   :  { %v644_v16 = vadd.f32 %v693_v48, %v643_v15 }
 0x877   :  { %648 = vst.msk [vmem:[%s1088_s8 + $0x8] sm:$0xff] %vm646_vm11, %v644_v16 }
 0x878   :  { %750 = dma.done.wait [#allocation3], 64  }
 0x879   :  { %751 = vsyncadd [#allocation3], 4294967232 }
 0x87a   :  { %668 = vsyncpa [#allocation3], 1 }

</bundles_post_ra>
